<compile_context>
chip_gen: v6e
topology: v6e:2x2x1
jax: 0.10.0
libtpu: 0.0.40
codegen_flags: <defaults>
</compile_context>

<pallas_src>
import functools

import jax
import jax.numpy as jnp
from jax import lax
from jax.experimental import pallas as pl
from jax.experimental.pallas import tpu as pltpu


def _round_up(n, m):
    return ((n + m - 1) // m) * m


def _fcv_kernel(x_ref, w1_ref, b1_ref, w2_ref, b2_ref, w3_ref, b3_ref, o_ref,
                *, sub, n_sub):
    """One batch tile: x_ref (TB, D_in) -> o_ref (1, TB).

    Weights stay VMEM-resident (constant index maps).  The batch tile is
    processed in `sub`-lane chunks with an unrolled loop so the packed
    (H, sub) activations fit in vregs.
    """
    b3 = b3_ref[0]  # scalar output bias from SMEM

    def body(j, carry):
        off = pl.multiple_of(j * sub, sub)
        x_sub = x_ref[pl.ds(off, sub), :]                        # (sub, D_in)

        # Layer 1: contract D_in of W1 (H0, D_in) with D_in of x (sub, D_in)
        # -> (H0, sub).  Batch lands on the lane axis directly (no wrapper
        # transpose, no lane-sparse (sub, H0) intermediate).
        h = lax.dot_general(w1_ref[...], x_sub,
                            (((1,), (1,)), ((), ())),
                            preferred_element_type=jnp.float32)
        h = jnp.maximum(h + b1_ref[...], 0.0)                    # (H0, sub)

        # Layer 2: (H1, H0) @ (H0, sub) -> (H1, sub) on the MXU.
        h = jnp.dot(w2_ref[...], h, preferred_element_type=jnp.float32)
        h = jnp.maximum(h + b2_ref[...], 0.0)                    # (H1, sub)

        # Output layer (H1 -> 1): VPU multiply + cross-sublane (XLU) reduce
        # instead of a 1-column MXU matmul; the store is lane-dense.
        v = jnp.sum(h * w3_ref[...], axis=0, keepdims=True) + b3  # (1, sub)
        o_ref[:, pl.ds(off, sub)] = v
        return carry

    lax.fori_loop(0, n_sub, body, 0, unroll=True)


def fcv_forward(x, params, *, tb=2048, sub=512):
    """Fused FCV forward. x: (B, D_in) float32. Returns (B, 1) float32."""
    w1, b1, w2, b2, w3, b3 = params  # torch layout: W (out, in), b (out,)
    B, d_in = x.shape
    h0 = w1.shape[0]
    h1 = w2.shape[0]

    # Batch tile (lane axis of the output): multiple of 128, big enough to
    # amortize the ~0.35us per-grid-step overhead, small enough that the grid
    # has >= 2 steps (v7x megacore) whenever the batch allows it.
    TB = min(_round_up(tb, 128), max(128, _round_up((B + 1) // 2, 128)))
    SUB = min(_round_up(sub, 128), TB)
    TB = _round_up(TB, SUB)
    B_pad = _round_up(B, TB)

    # x stays in its natural (B, D_in) layout: no wrapper-side transpose.
    # Rows are only padded when B is not a multiple of the tile; padded rows
    # never mix with real outputs and are sliced off below.
    if B_pad != B:
        x = jnp.pad(x, ((0, B_pad - B), (0, 0)))

    # Column-form biases / output weights so each layer is y = W @ x + b with
    # the batch on the lane axis.  (Fixes the previous (1, H1)-vs-(H1, 1) bug.)
    x = x.astype(jnp.float32)
    w1f = w1.astype(jnp.float32)
    w2f = w2.astype(jnp.float32)
    b1c = jnp.reshape(b1, (h0, 1)).astype(jnp.float32)
    b2c = jnp.reshape(b2, (h1, 1)).astype(jnp.float32)
    w3c = jnp.reshape(w3, (h1, 1)).astype(jnp.float32)
    b3s = jnp.reshape(b3, (1,)).astype(jnp.float32)

    kernel = functools.partial(_fcv_kernel, sub=SUB, n_sub=TB // SUB)
    const = lambda i: (0, 0)  # weights/biases: one block, resident across steps

    out_t = pl.pallas_call(
        kernel,
        out_shape=jax.ShapeDtypeStruct((1, B_pad), jnp.float32),
        grid=(B_pad // TB,),
        in_specs=[
            pl.BlockSpec((TB, d_in), lambda i: (i, 0)),          # x tile (batch rows)
            pl.BlockSpec((h0, d_in), const),                     # W1 (out, in)
            pl.BlockSpec((h0, 1), const),                        # b1 column
            pl.BlockSpec((h1, h0), const),                       # W2 (out, in)
            pl.BlockSpec((h1, 1), const),                        # b2 column
            pl.BlockSpec((h1, 1), const),                        # w3 column
            pl.BlockSpec(memory_space=pltpu.MemorySpace.SMEM),   # b3 scalar
        ],
        out_specs=pl.BlockSpec((1, TB), lambda i: (0, i)),       # lane-dense store
        compiler_params=pltpu.CompilerParams(
            dimension_semantics=("parallel",),  # shard batch across TCs on v7x
        ),
    )(x, w1f, b1c, w2f, b2c, w3c, b3s)

    return out_t[0, :B].reshape(B, 1)


def init_fcv_params(key, input_shape, hidden_layers):
    """Deterministic synthetic parameters matching FCV's layer shapes.

    Torch layout: weights (out, in), biases (out,).
    """
    dims = [input_shape] + list(hidden_layers) + [1]
    params = []
    for i in range(len(dims) - 1):
        key, kw, kb = jax.random.split(key, 3)
        bound = float(dims[i]) ** -0.5  # same scale family as torch Linear init
        w = jax.random.uniform(kw, (dims[i + 1], dims[i]),
                               minval=-bound, maxval=bound, dtype=jnp.float32)
        b = jax.random.uniform(kb, (dims[i + 1],),
                               minval=-bound, maxval=bound, dtype=jnp.float32)
        params.extend([w, b])
    return tuple(params)


def fcv_reference(x, params):
    """Pure-JAX reference (mirrors torch.nn.Linear: y = x @ W.T + b)."""
    w1, b1, w2, b2, w3, b3 = params
    h = jnp.maximum(x @ w1.T + b1, 0.0)
    h = jnp.maximum(h @ w2.T + b2, 0.0)
    return h @ w3.T + b3


if __name__ == "__main__":
    key = jax.random.PRNGKey(0)
    key, kx = jax.random.split(key)

    # CartPole-style shapes: obs dim 4, two hidden layers of 32, batch 2.
    batch, input_shape, hidden_layers = 2, 4, [32, 32]

    x = jax.random.normal(kx, (batch, input_shape), dtype=jnp.float32)
    params = init_fcv_params(key, input_shape, hidden_layers)

    out = jax.block_until_ready(fcv_forward(x, params))
    ref = fcv_reference(x, params)

    assert out.shape == (batch, 1)
    assert jnp.allclose(out, ref, atol=1e-5, rtol=1e-5)

    print("KERNEL_OK")
</pallas_src>

<mosaic_0001>
module attributes {stable_mosaic.version = 11 : i64} {
  func.func @_fcv_kernel(%arg0: i32, %arg1: memref<128x4xf32, #tpu.memory_space<vmem>>, %arg2: memref<32x4xf32, #tpu.memory_space<vmem>>, %arg3: memref<32x1xf32, #tpu.memory_space<vmem>>, %arg4: memref<32x32xf32, #tpu.memory_space<vmem>>, %arg5: memref<32x1xf32, #tpu.memory_space<vmem>>, %arg6: memref<32x1xf32, #tpu.memory_space<vmem>>, %arg7: memref<1xf32, #tpu.memory_space<smem>>, %arg8: memref<1x128xf32, #tpu.memory_space<vmem>>) attributes {dimension_semantics = [#tpu.dimension_semantics<parallel>], iteration_bounds = array<i64: 1>, scalar_prefetch = 0 : i64, scratch_operands = 0 : i64, tpu.core_type = #tpu.core_type<tc>, window_params = [{transform_indices = @transform_0, window_bounds = array<i64: 128, 4>}, {pipeline_mode = #tpu.pipeline_mode<synchronous>, transform_indices = @transform_1, window_bounds = array<i64: 32, 4>}, {pipeline_mode = #tpu.pipeline_mode<synchronous>, transform_indices = @transform_2, window_bounds = array<i64: 32, 1>}, {pipeline_mode = #tpu.pipeline_mode<synchronous>, transform_indices = @transform_3, window_bounds = array<i64: 32, 32>}, {pipeline_mode = #tpu.pipeline_mode<synchronous>, transform_indices = @transform_4, window_bounds = array<i64: 32, 1>}, {pipeline_mode = #tpu.pipeline_mode<synchronous>, transform_indices = @transform_5, window_bounds = array<i64: 32, 1>}, {transform_indices = @transform_6, window_bounds = array<i64: 1>}, {transform_indices = @transform_7, window_bounds = array<i64: 1, 128>}]} {
    %c0 = arith.constant 0 : index
    %0 = memref.load %arg7[%c0] : memref<1xf32, #tpu.memory_space<smem>>
    %c0_i32 = arith.constant 0 : i32
    %c128_i32 = arith.constant 128 : i32
    %1 = arith.muli %c0_i32, %c128_i32 : i32
    %2 = tpu.assume_multiple %1, 128 : i32
    %3 = arith.index_cast %2 : i32 to index
    %c0_0 = arith.constant 0 : index
    %4 = vector.load %arg1[%3, %c0_0] : memref<128x4xf32, #tpu.memory_space<vmem>>, vector<128x4xf32>
    %c0_1 = arith.constant 0 : index
    %c0_2 = arith.constant 0 : index
    %5 = vector.load %arg2[%c0_1, %c0_2] : memref<32x4xf32, #tpu.memory_space<vmem>>, vector<32x4xf32>
    %cst = arith.constant dense<0.000000e+00> : vector<32x128xf32>
    %6 = tpu.matmul %5, %4, %cst {dimension_numbers = #tpu.dot_dimension_numbers<[1], [1], [0], [0], [0, 0, 1, 0], [], []>} : vector<32x4xf32>, vector<128x4xf32>, vector<32x128xf32> -> vector<32x128xf32>
    %c0_3 = arith.constant 0 : index
    %c0_4 = arith.constant 0 : index
    %7 = vector.load %arg3[%c0_3, %c0_4] : memref<32x1xf32, #tpu.memory_space<vmem>>, vector<32x1xf32>
    %8 = vector.broadcast %7 : vector<32x1xf32> to vector<32x128xf32>
    %9 = arith.addf %6, %8 : vector<32x128xf32>
    %cst_5 = arith.constant 0.000000e+00 : f32
    %10 = vector.broadcast %cst_5 : f32 to vector<32x128xf32>
    %11 = arith.maximumf %9, %10 : vector<32x128xf32>
    %c0_6 = arith.constant 0 : index
    %c0_7 = arith.constant 0 : index
    %12 = vector.load %arg4[%c0_6, %c0_7] : memref<32x32xf32, #tpu.memory_space<vmem>>, vector<32x32xf32>
    %cst_8 = arith.constant dense<0.000000e+00> : vector<32x128xf32>
    %13 = tpu.matmul %12, %11, %cst_8 {dimension_numbers = #tpu.dot_dimension_numbers<[1], [0], [0], [1], [0, 0, 1, 1], [], []>} : vector<32x32xf32>, vector<32x128xf32>, vector<32x128xf32> -> vector<32x128xf32>
    %c0_9 = arith.constant 0 : index
    %c0_10 = arith.constant 0 : index
    %14 = vector.load %arg5[%c0_9, %c0_10] : memref<32x1xf32, #tpu.memory_space<vmem>>, vector<32x1xf32>
    %15 = vector.broadcast %14 : vector<32x1xf32> to vector<32x128xf32>
    %16 = arith.addf %13, %15 : vector<32x128xf32>
    %cst_11 = arith.constant 0.000000e+00 : f32
    %17 = vector.broadcast %cst_11 : f32 to vector<32x128xf32>
    %18 = arith.maximumf %16, %17 : vector<32x128xf32>
    %c0_12 = arith.constant 0 : index
    %c0_13 = arith.constant 0 : index
    %19 = vector.load %arg6[%c0_12, %c0_13] : memref<32x1xf32, #tpu.memory_space<vmem>>, vector<32x1xf32>
    %20 = vector.broadcast %19 : vector<32x1xf32> to vector<32x128xf32>
    %21 = arith.mulf %18, %20 : vector<32x128xf32>
    %cst_14 = arith.constant dense<0.000000e+00> : vector<128xf32>
    %22 = vector.multi_reduction <add>, %21, %cst_14 [0] : vector<32x128xf32> to vector<128xf32>
    %23 = vector.shape_cast %22 : vector<128xf32> to vector<1x128xf32>
    %24 = vector.broadcast %0 : f32 to vector<1x128xf32>
    %25 = arith.addf %23, %24 : vector<1x128xf32>
    %c0_15 = arith.constant 0 : index
    %26 = arith.index_cast %2 : i32 to index
    %27 = vector.load %arg8[%c0_15, %26] : memref<1x128xf32, #tpu.memory_space<vmem>>, vector<1x128xf32>
    tpu.vector_store %arg8[%c0_15, %26], %25 {strides = array<i32>} : memref<1x128xf32, #tpu.memory_space<vmem>>, vector<1x128xf32>,
    %c1_i32 = arith.constant 1 : i32
    return
  }
  func.func @transform_0(%arg0: i32) -> (i32, i32) {
    %c0_i32 = arith.constant 0 : i32
    %c0_i32_0 = arith.constant 0 : i32
    return %arg0, %c0_i32 : i32, i32
  }
  func.func @transform_1(%arg0: i32) -> (i32, i32) {
    %c0_i32 = arith.constant 0 : i32
    %c0_i32_0 = arith.constant 0 : i32
    %c0_i32_1 = arith.constant 0 : i32
    return %c0_i32, %c0_i32_0 : i32, i32
  }
  func.func @transform_2(%arg0: i32) -> (i32, i32) {
    %c0_i32 = arith.constant 0 : i32
    %c0_i32_0 = arith.constant 0 : i32
    %c0_i32_1 = arith.constant 0 : i32
    return %c0_i32, %c0_i32_0 : i32, i32
  }
  func.func @transform_3(%arg0: i32) -> (i32, i32) {
    %c0_i32 = arith.constant 0 : i32
    %c0_i32_0 = arith.constant 0 : i32
    %c0_i32_1 = arith.constant 0 : i32
    return %c0_i32, %c0_i32_0 : i32, i32
  }
  func.func @transform_4(%arg0: i32) -> (i32, i32) {
    %c0_i32 = arith.constant 0 : i32
    %c0_i32_0 = arith.constant 0 : i32
    %c0_i32_1 = arith.constant 0 : i32
    return %c0_i32, %c0_i32_0 : i32, i32
  }
  func.func @transform_5(%arg0: i32) -> (i32, i32) {
    %c0_i32 = arith.constant 0 : i32
    %c0_i32_0 = arith.constant 0 : i32
    %c0_i32_1 = arith.constant 0 : i32
    return %c0_i32, %c0_i32_0 : i32, i32
  }
  func.func @transform_6(%arg0: i32) -> i32 {
    %c0_i32 = arith.constant 0 : i32
    %c0_i32_0 = arith.constant 0 : i32
    return %c0_i32 : i32
  }
  func.func @transform_7(%arg0: i32) -> (i32, i32) {
    %c0_i32 = arith.constant 0 : i32
    %c0_i32_0 = arith.constant 0 : i32
    return %c0_i32, %arg0 : i32, i32
  }
}

</mosaic_0001>

<bundles_post_ra>
// kernel: tpu_custom_call.1
= control target key start
LH: loop header
LB: loop body
LE: loop exit
PB: predicated region body
PF: predicated region fallthrough
CT: control target
= control target key end

     0   :  { %vm73_vm0 = vcmask 31744   ;;  %v537_v2 = vmov 0   ;;  %s733_s0 = inlined_call_operand.vmem [shape: f32[128,4], index: 0, kind: input, shape index: {}]   ;;  %s734_s1 = inlined_call_operand.vmem [shape: f32[32,4], index: 1, kind: input, shape index: {}]   ;;  %s735_s2 = inlined_call_operand.vmem [shape: f32[32,1], index: 2, kind: input, shape index: {}]   ;;  %s736_s3 = inlined_call_operand.vmem [shape: f32[32,32], index: 3, kind: input, shape index: {}]   ;;  %s737_s4 = inlined_call_operand.vmem [shape: f32[32,1], index: 4, kind: input, shape index: {}]   ;;  %s738_s5 = inlined_call_operand.vmem [shape: f32[32,1], index: 5, kind: input, shape index: {}]   ;;  %s739_s6 = inlined_call_operand.<no memory space> [shape: f32[1], index: 6, kind: input, shape index: {}]   ;;  %s740_s7 = inlined_call_operand.hbm [shape: f32[1,128], index: 7, kind: output, shape index: {}]  }
   0x1   :  { %v44_v0 = vld [vmem:[%s733_s0 + $0x78] sm:$0xff]  ;;  %v43_v1 = vld [vmem:[%s733_s0 + $0x70] sm:$0xff]  ;;  %513 = vset.pattern.permute.xlu0 %v537_v2  ;;  %514 = vset.pattern.permute.xlu1 %v537_v2  ;;  %v42_v3 = vld [vmem:[%s733_s0 + $0x68] sm:$0xff] }
   0x2   :  { %459 = vmatprep.subr.msk.mxu0 %vm73_vm0, %v44_v0  ;;  %v45_v4 = vld [vmem:[%s734_s1] sm:$0xff]  ;;  %v52_v5 = vld [vmem:[%s735_s2 + $0x18] sm:$0xff]  ;;  %v50_v6 = vld [vmem:[%s735_s2 + $0x8] sm:$0xff] }
   0x3   :  { %460 = vmatpush3.xpose.msk.msra.mxu0 %vm73_vm0, %v44_v0  ;;  %491 = vmatprep.mubr.msk.f32.mxu0 %vm73_vm0, %v45_v4  ;;  %v41_v7 = vld [vmem:[%s733_s0 + $0x60] sm:$0xff]  ;;  %v51_v8 = vld [vmem:[%s735_s2 + $0x10] sm:$0xff] }
   0x4   :  { %461 = vmatprep.subr.msk.mxu0 %vm73_vm0, %v43_v1  ;;  %70 = vperm.xlu0 %513, %v52_v5   ;;  %v49_v9 = vld [vmem:[%s735_s2] sm:$0xff] }
   0x5   :  { %60 = vperm.xlu1 %514, %v50_v6  }
   0x7   :  { %462 = vmatpush3.xpose.msk.msra.mxu0 %vm73_vm0, %v43_v1 }
   0x8   :  { %463 = vmatprep.subr.msk.mxu0 %vm73_vm0, %v42_v3 }
   0xb   :  { %464 = vmatpush3.xpose.msk.msra.mxu0 %vm73_vm0, %v42_v3 }
   0xc   :  { %13 = vsyncpa [#allocation4], 0  ;;  %465 = vmatprep.subr.msk.mxu0 %vm73_vm0, %v41_v7  ;;  %65 = vperm.xlu0 %513, %v51_v8   ;;  %v40_v10 = vld [vmem:[%s733_s0 + $0x58] sm:$0xff]  ;;  %v227_v11 = vld [vmem:[%s737_s4] sm:$0xff]  ;;  %vm251_vm1 = vcmask 261120   ;;  %s538_s21 = smov [#allocation3]  }
   0xd   :  { %55 = vperm.xlu1 %514, %v49_v9   ;;  %v228_v12 = vld [vmem:[%s737_s4 + $0x8] sm:$0xff]  ;;  %v39_v13 = vld [vmem:[%s733_s0 + $0x50] sm:$0xff]  ;;  %v230_v15 = vld [vmem:[%s737_s4 + $0x18] sm:$0xff] }
   0xe   :  { %v229_v14 = vld [vmem:[%s737_s4 + $0x10] sm:$0xff]  ;;  %v38_v16 = vld [vmem:[%s733_s0 + $0x48] sm:$0xff]  ;;  %v353_v17 = vld [vmem:[%s738_s5] sm:$0xff] }
   0xf   :  { %466 = vmatpush3.xpose.msk.msra.mxu0 %vm73_vm0, %v41_v7  ;;  %v354_v18 = vld [vmem:[%s738_s5 + $0x8] sm:$0xff]  ;;  %v37_v19 = vld [vmem:[%s733_s0 + $0x40] sm:$0xff]  ;;  %v355_v20 = vld [vmem:[%s738_s5 + $0x10] sm:$0xff] }
  0x10   :  { %467 = vmatprep.subr.msk.mxu0 %vm73_vm0, %v40_v10  ;;  %233 = vperm.xlu0 %513, %v227_v11   ;;  %v356_v21 = vld [vmem:[%s738_s5 + $0x18] sm:$0xff]  ;;  %v35_v23 = vld [vmem:[%s733_s0 + $0x30] sm:$0xff]  ;;  %v34_v24 = vld [vmem:[%s733_s0 + $0x28] sm:$0xff]  ;;  %s399_s5 = sshll.u32 %s538_s21, 4  ;;  %s400_s5 = int_to_ptr.vmem [resolvable:$true] %s399_s5 }
  0x11   :  { %238 = vperm.xlu1 %514, %v228_v12   ;;  %v36_v22 = vld [vmem:[%s733_s0 + $0x38] sm:$0xff]  ;;  %v33_v25 = vld [vmem:[%s733_s0 + $0x20] sm:$0xff]  ;;  %v31_v27 = vld [vmem:[%s733_s0 + $0x10] sm:$0xff]  ;;  %s515_s22 = scalar_lea.vmem %s400_s5, 16  ;;  %s519_s23 = scalar_lea.vmem %s400_s5, 32 }
  0x12   :  { %v32_v26 = vld [vmem:[%s733_s0 + $0x18] sm:$0xff]  ;;  %v30_v28 = vld [vmem:[%s733_s0 + $0x8] sm:$0xff]  ;;  %v29_v29 = vld [vmem:[%s733_s0] sm:$0xff]  ;;  %p516_p0 = scmp.ne.s32.totalorder %s400_s5, %s515_s22  ;;  %p520_p1 = scmp.lt.s32.totalorder %s400_s5, %s400_s5 }
  0x13   :  { %468 = vmatpush3.xpose.msk.msra.mxu0 %vm73_vm0, %v40_v10  ;;  %v46_v30 = vld [vmem:[%s734_s1 + $0x8] sm:$0xff]  ;;  %v47_v31 = vld [vmem:[%s734_s1 + $0x10] sm:$0xff]  ;;  %v48_v32 = vld [vmem:[%s734_s1 + $0x18] sm:$0xff]  ;;  %p521_p2 = scmp.lt.s32.totalorder %s519_s23, %s515_s22 }
  0x14   :  { %469 = vmatprep.subr.msk.mxu0 %vm73_vm0, %v39_v13  ;;  %243 = vperm.xlu0 %513, %v229_v14   ;;  %v223_v33 = vld [vmem:[%s736_s3] sm:$0xff]  ;;  %v224_v50 = vld [vmem:[%s736_s3 + $0x8] sm:$0xff]  ;;  %v225_v51 = vld [vmem:[%s736_s3 + $0x10] sm:$0xff] }
  0x15   :  { %248 = vperm.xlu1 %514, %v230_v15   ;;  %505 = vmatprep.mubr.msk.f32.mxu1 %vm251_vm1, %v223_v33  ;;  %v226_v52 = vld [vmem:[%s736_s3 + $0x18] sm:$0xff]  ;;  %p522_p3 = por %p521_p2, %p520_p1 }
  0x17   :  { %470 = vmatpush3.xpose.msk.msra.mxu0 %vm73_vm0, %v39_v13  ;;  %p523_p4 = pnand %p522_p3, %p516_p0 }
  0x18   :  { %471 = vmatprep.subr.msk.mxu0 %vm73_vm0, %v38_v16  ;;  %359 = vperm.xlu0 %513, %v353_v17  }
  0x19   :  { %364 = vperm.xlu1 %514, %v354_v18  }
  0x1b   :  { %472 = vmatpush3.xpose.msk.msra.mxu0 %vm73_vm0, %v38_v16 }
  0x1c   :  { %473 = vmatprep.subr.msk.mxu0 %vm73_vm0, %v37_v19  ;;  %369 = vperm.xlu0 %513, %v355_v20  }
  0x1d   :  { %374 = vperm.xlu1 %514, %v356_v21   ;;  %v390_v21 = vstv %s739_s6 }
  0x1f   :  { %474 = vmatpush3.xpose.msk.msra.mxu0 %vm73_vm0, %v37_v19 }
  0x20   :  { %475 = vmatprep.subr.msk.mxu0 %vm73_vm0, %v36_v22 }
  0x23   :  { %476 = vmatpush3.xpose.msk.msra.mxu0 %vm73_vm0, %v36_v22 }
  0x24   :  { %477 = vmatprep.subr.msk.mxu0 %vm73_vm0, %v35_v23 }
  0x27   :  { %478 = vmatpush3.xpose.msk.msra.mxu0 %vm73_vm0, %v35_v23 }
  0x28   :  { %479 = vmatprep.subr.msk.mxu0 %vm73_vm0, %v34_v24 }
  0x2b   :  { %480 = vmatpush3.xpose.msk.msra.mxu0 %vm73_vm0, %v34_v24 }
  0x2c   :  { %481 = vmatprep.subr.msk.mxu0 %vm73_vm0, %v33_v25 }
  0x2f   :  { %482 = vmatpush3.xpose.msk.msra.mxu0 %vm73_vm0, %v33_v25 }
  0x30   :  { %483 = vmatprep.subr.msk.mxu0 %vm73_vm0, %v32_v26 }
  0x33   :  { %484 = vmatpush3.xpose.msk.msra.mxu0 %vm73_vm0, %v32_v26 }
  0x34   :  { %485 = vmatprep.subr.msk.mxu0 %vm73_vm0, %v31_v27 }
  0x37   :  { %486 = vmatpush3.xpose.msk.msra.mxu0 %vm73_vm0, %v31_v27 }
  0x38   :  { %487 = vmatprep.subr.msk.mxu0 %vm73_vm0, %v30_v28 }
  0x3b   :  { %488 = vmatpush3.xpose.msk.msra.mxu0 %vm73_vm0, %v30_v28 }
  0x3c   :  { %489 = vmatprep.subr.msk.mxu0 %vm73_vm0, %v29_v29 }
  0x3f   :  { %490 = vmatpush3.xpose.msk.msra.mxu0 %vm73_vm0, %v29_v29 }
  0x42   :  { %492 = vmatmul.mubr.msk.f32.vlgmr.msra.gmra.mxu0 %vm73_vm0, %v46_v30 }
  0x43   :  { %494 = vmatprep.mubr.msk.f32.mxu0 %vm73_vm0, %v47_v31 }
  0x46   :  { %495 = vmatmul.mubr.msk.f32.gmra.mxu0 %vm73_vm0, %v48_v32 }
  0x7f   :  { %v71_v34 = vpop.permute.xlu0 %70 }
  0x80   :  { %v61_v36 = vpop.permute.xlu1 %60 }
  0x87   :  { %v66_v40 = vpop.permute.xlu0 %65 }
  0x88   :  { %v56_v45 = vpop.permute.xlu1 %55 }
  0x8b   :  { %v234_v53 = vpop.permute.xlu0 %233 }
  0x8c   :  { %v239_v54 = vpop.permute.xlu1 %238 }
  0x8f   :  { %v244_v55 = vpop.permute.xlu0 %243 }
  0x90   :  { %v249_v56 = vpop.permute.xlu1 %248 }
  0x93   :  { %v360_v61 = vpop.permute.xlu0 %359 }
  0x94   :  { %v365_v2 = vpop.permute.xlu1 %364 }
  0x97   :  { %v370_v9 = vpop.permute.xlu0 %369 }
  0x98   :  { %v375_v12 = vpop.permute.xlu1 %374 }
 0x102   :  { %v493_v35 = vpop.f32.mrf.mxu0 }
 0x103   :  { %v206_v42 = vadd.f32 %v493_v35, %v61_v36 }
 0x104   :  { %v200_v37 = vpop.f32.mrf.mxu0 }
 0x105   :  { %v201_v46 = vadd.f32 %v200_v37, %v56_v45  ;;  %v220_v48 = vmax.f32 %v206_v42, 0.0 }
 0x106   :  { %v496_v38 = vpop.f32.mrf.mxu0 }
 0x107   :  { %v216_v39 = vadd.f32 %v496_v38, %v71_v34  ;;  %v219_v49 = vmax.f32 %v201_v46, 0.0 }
 0x108   :  { %v210_v41 = vpop.f32.mrf.mxu0 }
 0x109   :  { %v222_v43 = vmax.f32 %v216_v39, 0.0  ;;  %v211_v44 = vadd.f32 %v210_v41, %v66_v40 }
 0x10b   :  { %v221_v47 = vmax.f32 %v211_v44, 0.0  ;;  %497 = vmatprep.subr.mxu1 %v222_v43 }
 0x10c   :  { %498 = vmatpush3.msra.mxu1 %v222_v43 }
 0x10d   :  { %499 = vmatprep.subr.mxu1 %v221_v47 }
 0x10e   :  { %500 = vmatpush3.msra.mxu1 %v221_v47 }
 0x10f   :  { %501 = vmatprep.subr.mxu1 %v220_v48 }
 0x110   :  { %502 = vmatpush3.msra.mxu1 %v220_v48 }
 0x111   :  { %503 = vmatprep.subr.mxu1 %v219_v49 }
 0x112   :  { %504 = vmatpush3.msra.mxu1 %v219_v49 }
 0x113   :  { %506 = vmatmul.mubr.msk.f32.vlgmr.msra.gmra.mxu1 %vm251_vm1, %v224_v50 }
 0x114   :  { %508 = vmatprep.mubr.msk.f32.mxu1 %vm251_vm1, %v225_v51 }
 0x117   :  { %509 = vmatmul.mubr.msk.f32.gmra.mxu1 %vm251_vm1, %v226_v52 }
 0x1d3   :  { %v507_v57 = vpop.f32.mrf.mxu1 }
 0x1d4   :  { %v336_v58 = vadd.f32 %v507_v57, %v239_v54 }
 0x1d5   :  { %v330_v59 = vpop.f32.mrf.mxu1 }
 0x1d6   :  { %v331_v60 = vadd.f32 %v330_v59, %v234_v53  ;;  %v350_v63 = vmax.f32 %v336_v58, 0.0 }
 0x1d7   :  { %v510_v62 = vpop.f32.mrf.mxu1 }
 0x1d8   :  { %v349_v0 = vmax.f32 %v331_v60, 0.0  ;;  %v346_v1 = vadd.f32 %v510_v62, %v249_v56  ;;  %v378_v6 = vmul.f32 %v365_v2, %v350_v63 }
 0x1d9   :  { %v340_v3 = vpop.f32.mrf.mxu1 }
 0x1da   :  { %v377_v4 = vmul.f32 %v360_v61, %v349_v0  ;;  %v341_v5 = vadd.f32 %v340_v3, %v244_v55  ;;  %v352_v7 = vmax.f32 %v346_v1, 0.0 }
 0x1dc   :  { %v351_v8 = vmax.f32 %v341_v5, 0.0  ;;  %v381_v10 = vadd.f32 %v378_v6, %v377_v4  ;;  %v380_v13 = vmul.f32 %v375_v12, %v352_v7 }
 0x1de   :  { %v379_v11 = vmul.f32 %v370_v9, %v351_v8 }
 0x1e0   :  { %v382_v14 = vadd.f32 %v381_v10, %v379_v11 }
 0x1e2   :  { %v383_v15 = vadd.f32 %v382_v14, %v380_v13 }
 0x1e4   :  { %v384_v16 = vrot.slane %v383_v15, 4 }
 0x1e6   :  { %v385_v17 = vadd.f32 %v384_v16, %v383_v15 }
 0x1e8   :  { %v386_v18 = vrot.slane %v385_v17, 2 }
 0x1ea   :  { %v387_v19 = vadd.f32 %v386_v18, %v385_v17 }
 0x1ec   :  { %v388_v20 = vrot.slane %v387_v19, 1 }
 0x1ee   :  { %v389_v22 = vadd.f32 %v388_v20, %v387_v19 }
 0x1f0   :  { %v391_v23 = vadd.f32 %v390_v21, %v389_v22 }
 0x1f2   :  { %392 = vst [vmem:[#allocation3] sm:$0x1] %v391_v23 }
 0x1f3   :  { %526 = shalt.err (!%p523_p4)
}
 0x1f4   :  { %402 = dma.vmem_to_hbm [thread:$0]  %s400_s5, 16, %s740_s7, [#allocation4]  }
 0x1f5   :  { %535 = dma.done.wait [#allocation4], 16  }
 0x1f6   :  { %536 = vsyncadd [#allocation4], 4294967280 }
 0x1f7   :  { %406 = vsyncpa [#allocation4], 1 }

</bundles_post_ra>
